<compile_context>
chip_gen: v6e
topology: v6e:2x2x1
jax: 0.10.0
libtpu: 0.0.40
codegen_flags: <defaults>
</compile_context>

<pallas_src>
import functools

import jax
import jax.numpy as jnp
from jax.experimental import pallas as pl
from jax.experimental.pallas import tpu as pltpu


def _mf_partial_kernel(pred_ref, item_ref, tgt_ref, m_ref, l_ref, t_ref,
                       *, n_rows, tiles_per_split):
    """One (split, item-tile) step: streamed scores tile + online log-sum-exp."""
    c = pl.program_id(0)            # item-axis split (megacore-parallel on v7x)
    n = pl.program_id(1)            # item tile within the split (reduction)

    @pl.when(n == 0)
    def _init():
        m_ref[0] = jnp.full(m_ref.shape[1:], -jnp.inf, jnp.float32)
        l_ref[0] = jnp.zeros(l_ref.shape[1:], jnp.float32)
        t_ref[0] = jnp.zeros(t_ref.shape[1:], jnp.float32)

    pred = pred_ref[...]            # (Bp, D)  compute dtype, resident
    item = item_ref[...]            # (D, TN)  streamed column tile of item^T
    tgt = tgt_ref[...]              # (Bp, 1)  int32 target item ids (== col idx)

    # scores[b, j] = sum_d pred[b, d] * item[d, j]   (NN form, lane-dense tile)
    scores = jnp.dot(pred, item, preferred_element_type=jnp.float32)  # (Bp, TN) f32

    bp, tn = scores.shape
    col = (c * tiles_per_split + n) * tn + jax.lax.broadcasted_iota(
        jnp.int32, (bp, tn), 1)
    valid = (col >= 1) & (col < n_rows)     # drop pad column 0 + padded tail

    # Target logit: each row's target lives in exactly one tile across all
    # splits, so the masked accumulate is exact.
    t_ref[0] += jnp.sum(jnp.where(col == tgt, scores, 0.0), axis=-1, keepdims=True)

    # Online log-sum-exp with max rebasing; NaN-proof for fully-masked tiles
    # (possible for the round-up tiles of the last split).
    m_prev = m_ref[0]
    m_tile = jnp.max(jnp.where(valid, scores, -jnp.inf), axis=-1, keepdims=True)
    m_new = jnp.maximum(m_prev, m_tile)
    alpha = jnp.exp(jnp.where(m_new == -jnp.inf, 0.0, m_prev - m_new))
    p = jnp.where(valid, jnp.exp(scores - m_new), 0.0)
    l_ref[0] = alpha * l_ref[0] + jnp.sum(p, axis=-1, keepdims=True)
    m_ref[0] = m_new


def mf_forward_loss(his_seqs, users, targets, item_emb_table, user_emb_table,
                    *, tn=1024, num_splits=2, compute_dtype=jnp.bfloat16):
    """Mean cross-entropy loss matching MF.forward (dropout == identity)."""
    b, _ = his_seqs.shape
    n_rows, d = item_emb_table.shape          # n_items + 1 rows; row 0 is padding

    # ---- XLA glue: gathers + masked mean pooling (pad row 0 of the table is 0) ----
    his_sum = jnp.take(item_emb_table, his_seqs, axis=0).sum(axis=1)          # (B, D)
    counts = (his_seqs != 0).sum(axis=1, keepdims=True).astype(jnp.float32)
    counts = jnp.maximum(counts, 1.0)          # guard all-padding history rows
    pred = jnp.take(user_emb_table, users, axis=0) + his_sum / counts          # (B, D)

    # pad batch to the sublane multiple (8); cast pred ONCE (hoisted out of kernel)
    bp = max(8, -(-b // 8) * 8)
    if bp != b:
        pred = jnp.pad(pred, ((0, bp - b), (0, 0)))
        targets = jnp.pad(targets, (0, bp - b), constant_values=1)
    pred_c = pred.astype(compute_dtype)
    tgt = targets.astype(jnp.int32).reshape(bp, 1)

    # ---- item table: lane-dense transposed (D, N) layout, padded so every
    # (split, tile) block maps in-bounds.  Production should store the table
    # pre-transposed / bf16 to avoid this per-call copy.
    tn = max(128, min(int(tn), pl.cdiv(n_rows, 128) * 128))   # multiple of 128
    total_tiles = pl.cdiv(n_rows, tn)
    tiles_per_split = pl.cdiv(total_tiles, num_splits)
    n_cols = num_splits * tiles_per_split * tn
    item_t = jnp.pad(item_emb_table.astype(compute_dtype).T,
                     ((0, 0), (0, n_cols - n_rows)))           # (D, n_cols)

    kernel = functools.partial(_mf_partial_kernel, n_rows=n_rows,
                               tiles_per_split=tiles_per_split)

    # Honest VMEM estimate: double-buffered item tile + resident pred/tgt +
    # the tiny (1, Bp, 1) output blocks; scores live in vregs, not VMEM.
    isz = jnp.dtype(compute_dtype).itemsize
    vmem_needed = (2 * d * tn * isz        # double-buffered item tile
                   + 2 * bp * d * isz      # pred block
                   + 2 * bp * 4            # targets block (int32)
                   + 3 * 2 * bp * 4)       # m / l / t output blocks (f32)
    vmem_limit = int(min(max(2 * vmem_needed, 8 << 20), 48 << 20))

    part_shape = jax.ShapeDtypeStruct((num_splits, bp, 1), jnp.float32)
    part_spec = pl.BlockSpec((1, bp, 1), lambda c, n: (c, 0, 0))

    m, l, t = pl.pallas_call(
        kernel,
        out_shape=(part_shape, part_shape, part_shape),
        grid=(num_splits, tiles_per_split),
        in_specs=[
            pl.BlockSpec((bp, d), lambda c, n: (0, 0)),                  # pred (resident)
            pl.BlockSpec((d, tn), lambda c, n: (0, c * tiles_per_split + n)),  # item^T tile
            pl.BlockSpec((bp, 1), lambda c, n: (0, 0)),                  # targets (resident)
        ],
        out_specs=(part_spec, part_spec, part_spec),
        compiler_params=pltpu.CompilerParams(
            dimension_semantics=("parallel", "arbitrary"),   # splits || , item axis = reduction
            vmem_limit_bytes=vmem_limit),
    )(pred_c, item_t, tgt)

    # ---- tiny XLA epilogue: merge the per-split online-softmax partials ----
    a = m + jnp.log(l)                               # (S, Bp, 1); empty split -> -inf
    lse = jax.scipy.special.logsumexp(a, axis=0)     # (Bp, 1)
    tgt_logit = jnp.sum(t, axis=0)                   # (Bp, 1)
    per_row = (lse - tgt_logit)[:b, 0]               # drop padded batch rows
    return jnp.mean(per_row)


def _reference_loss(his_seqs, users, targets, item_emb_table, user_emb_table):
    """Pure-JAX f32 reference of the PyTorch forward (dropout = identity)."""
    user_emb = user_emb_table[users]
    his_emb = item_emb_table[his_seqs].sum(axis=1) / (
        (his_seqs != 0).sum(axis=1, keepdims=True).astype(jnp.float32))
    pred = user_emb + his_emb
    scores = pred @ item_emb_table[1:].T
    tgt = targets - 1
    logp = scores - jax.scipy.special.logsumexp(scores, axis=-1, keepdims=True)
    return -jnp.mean(jnp.take_along_axis(logp, tgt[:, None], axis=1))


if __name__ == "__main__":
    key = jax.random.PRNGKey(0)
    # Small but structurally interesting: 301 table rows exercise multi-tile
    # online-LSE, ragged tails, fully-masked tiles, and an empty split.
    n_items, n_users, d_model = 300, 16, 32
    B, L = 8, 8

    k1, k2, k3, k4, k5 = jax.random.split(key, 5)

    # "parameters" (row 0 of item_emb is zero, as in nn.Embedding(padding_idx=0))
    item_emb_table = jax.random.normal(k1, (n_items + 1, d_model), jnp.float32) * 0.1
    item_emb_table = item_emb_table.at[0].set(0.0)
    user_emb_table = jax.random.normal(k2, (n_users, d_model), jnp.float32) * 0.1

    # deterministic inputs
    his_seqs = jax.random.randint(k3, (B, L), 0, n_items + 1, jnp.int32)
    his_seqs = his_seqs.at[:, 0].set(jnp.maximum(his_seqs[:, 0], 1))  # >=1 non-pad item/row
    users = jax.random.randint(k4, (B,), 0, n_users, jnp.int32)
    targets = jax.random.randint(k5, (B,), 1, n_items + 1, jnp.int32)  # item ids 1..n_items

    ref = jax.block_until_ready(
        _reference_loss(his_seqs, users, targets, item_emb_table, user_emb_table))

    # f32 path with small tiles: tight correctness check + multi-tile reduction.
    loss_f32 = jax.block_until_ready(
        mf_forward_loss(his_seqs, users, targets, item_emb_table, user_emb_table,
                        tn=128, num_splits=2, compute_dtype=jnp.float32))
    assert jnp.allclose(loss_f32, ref, rtol=1e-4, atol=1e-4), (loss_f32, ref)

    # Production-style defaults: bf16 streaming, large tiles, 2-way item split.
    loss_bf16 = jax.block_until_ready(
        mf_forward_loss(his_seqs, users, targets, item_emb_table, user_emb_table))
    assert jnp.allclose(loss_bf16, ref, rtol=2e-2, atol=2e-2), (loss_bf16, ref)

    print("KERNEL_OK")
</pallas_src>

<mosaic_0001>
module attributes {stable_mosaic.version = 11 : i64} {
  func.func @_mf_partial_kernel(%arg0: i32, %arg1: i32, %arg2: memref<8x32xf32, #tpu.memory_space<vmem>>, %arg3: memref<32x128xf32, #tpu.memory_space<vmem>>, %arg4: memref<8x1xi32, #tpu.memory_space<vmem>>, %arg5: memref<1x8x1xf32, #tpu.memory_space<vmem>>, %arg6: memref<1x8x1xf32, #tpu.memory_space<vmem>>, %arg7: memref<1x8x1xf32, #tpu.memory_space<vmem>>) attributes {dimension_semantics = [#tpu.dimension_semantics<parallel>, #tpu.dimension_semantics<arbitrary>], iteration_bounds = array<i64: 2, 2>, scalar_prefetch = 0 : i64, scratch_operands = 0 : i64, tpu.core_type = #tpu.core_type<tc>, window_params = [{pipeline_mode = #tpu.pipeline_mode<synchronous>, transform_indices = @transform_0, window_bounds = array<i64: 8, 32>}, {transform_indices = @transform_1, window_bounds = array<i64: 32, 128>}, {pipeline_mode = #tpu.pipeline_mode<synchronous>, transform_indices = @transform_2, window_bounds = array<i64: 8, 1>}, {transform_indices = @transform_3, window_bounds = array<i64: 1, 8, 1>}, {transform_indices = @transform_4, window_bounds = array<i64: 1, 8, 1>}, {transform_indices = @transform_5, window_bounds = array<i64: 1, 8, 1>}]} {
    %c0_i32 = arith.constant 0 : i32
    %0 = arith.cmpi eq, %arg1, %c0_i32 : i32
    %1 = arith.extui %0 : i1 to i32
    %c0_i32_0 = arith.constant 0 : i32
    %2 = arith.cmpi ne, %1, %c0_i32_0 : i32
    scf.if %2 {
      %cst_32 = arith.constant 0xFF800000 : f32
      %60 = vector.broadcast %cst_32 : f32 to vector<8x1xf32>
      %c0_33 = arith.constant 0 : index
      %c0_34 = arith.constant 0 : index
      %c0_35 = arith.constant 0 : index
      %61 = vector.load %arg5[%c0_33, %c0_34, %c0_35] : memref<1x8x1xf32, #tpu.memory_space<vmem>>, vector<1x8x1xf32>
      %62 = vector.shape_cast %61 : vector<1x8x1xf32> to vector<8x1xf32>
      %63 = vector.shape_cast %60 : vector<8x1xf32> to vector<1x8x1xf32>
      tpu.vector_store %arg5[%c0_33, %c0_34, %c0_35], %63 {strides = array<i32>} : memref<1x8x1xf32, #tpu.memory_space<vmem>>, vector<1x8x1xf32>,
      %cst_36 = arith.constant 0.000000e+00 : f32
      %64 = vector.broadcast %cst_36 : f32 to vector<8x1xf32>
      %c0_37 = arith.constant 0 : index
      %c0_38 = arith.constant 0 : index
      %c0_39 = arith.constant 0 : index
      %65 = vector.load %arg6[%c0_37, %c0_38, %c0_39] : memref<1x8x1xf32, #tpu.memory_space<vmem>>, vector<1x8x1xf32>
      %66 = vector.shape_cast %65 : vector<1x8x1xf32> to vector<8x1xf32>
      %67 = vector.shape_cast %64 : vector<8x1xf32> to vector<1x8x1xf32>
      tpu.vector_store %arg6[%c0_37, %c0_38, %c0_39], %67 {strides = array<i32>} : memref<1x8x1xf32, #tpu.memory_space<vmem>>, vector<1x8x1xf32>,
      %cst_40 = arith.constant 0.000000e+00 : f32
      %68 = vector.broadcast %cst_40 : f32 to vector<8x1xf32>
      %c0_41 = arith.constant 0 : index
      %c0_42 = arith.constant 0 : index
      %c0_43 = arith.constant 0 : index
      %69 = vector.load %arg7[%c0_41, %c0_42, %c0_43] : memref<1x8x1xf32, #tpu.memory_space<vmem>>, vector<1x8x1xf32>
      %70 = vector.shape_cast %69 : vector<1x8x1xf32> to vector<8x1xf32>
      %71 = vector.shape_cast %68 : vector<8x1xf32> to vector<1x8x1xf32>
      tpu.vector_store %arg7[%c0_41, %c0_42, %c0_43], %71 {strides = array<i32>} : memref<1x8x1xf32, #tpu.memory_space<vmem>>, vector<1x8x1xf32>,
    } else {
    }
    %c0 = arith.constant 0 : index
    %c0_1 = arith.constant 0 : index
    %3 = vector.load %arg2[%c0, %c0_1] : memref<8x32xf32, #tpu.memory_space<vmem>>, vector<8x32xf32>
    %c0_2 = arith.constant 0 : index
    %c0_3 = arith.constant 0 : index
    %4 = vector.load %arg3[%c0_2, %c0_3] : memref<32x128xf32, #tpu.memory_space<vmem>>, vector<32x128xf32>
    %c0_4 = arith.constant 0 : index
    %c0_5 = arith.constant 0 : index
    %5 = vector.load %arg4[%c0_4, %c0_5] : memref<8x1xi32, #tpu.memory_space<vmem>>, vector<8x1xi32>
    %cst = arith.constant dense<0.000000e+00> : vector<8x128xf32>
    %6 = tpu.matmul %3, %4, %cst {dimension_numbers = #tpu.dot_dimension_numbers<[1], [0], [0], [1], [0, 0, 1, 1], [], []>} : vector<8x32xf32>, vector<32x128xf32>, vector<8x128xf32> -> vector<8x128xf32>
    %c2_i32 = arith.constant 2 : i32
    %7 = arith.muli %arg0, %c2_i32 : i32
    %8 = arith.addi %7, %arg1 : i32
    %c128_i32 = arith.constant 128 : i32
    %9 = arith.muli %8, %c128_i32 : i32
    %10 = tpu.iota {dimensions = array<i32: 1>} : vector<8x128xi32>
    %11 = vector.broadcast %9 : i32 to vector<8x128xi32>
    %12 = arith.addi %11, %10 : vector<8x128xi32>
    %c1_i32 = arith.constant 1 : i32
    %13 = vector.broadcast %c1_i32 : i32 to vector<8x128xi32>
    %14 = arith.cmpi sge, %12, %13 : vector<8x128xi32>
    %c301_i32 = arith.constant 301 : i32
    %15 = vector.broadcast %c301_i32 : i32 to vector<8x128xi32>
    %16 = arith.cmpi slt, %12, %15 : vector<8x128xi32>
    %17 = arith.andi %14, %16 : vector<8x128xi1>
    %c0_6 = arith.constant 0 : index
    %c0_7 = arith.constant 0 : index
    %c0_8 = arith.constant 0 : index
    %18 = vector.load %arg7[%c0_6, %c0_7, %c0_8] : memref<1x8x1xf32, #tpu.memory_space<vmem>>, vector<1x8x1xf32>
    %19 = vector.shape_cast %18 : vector<1x8x1xf32> to vector<8x1xf32>
    %20 = vector.broadcast %5 : vector<8x1xi32> to vector<8x128xi32>
    %21 = arith.cmpi eq, %12, %20 : vector<8x128xi32>
    %cst_9 = arith.constant 0.000000e+00 : f32
    %22 = vector.broadcast %cst_9 : f32 to vector<8x128xf32>
    %23 = arith.select %21, %6, %22 : vector<8x128xi1>, vector<8x128xf32>
    %cst_10 = arith.constant dense<0.000000e+00> : vector<8xf32>
    %24 = vector.multi_reduction <add>, %23, %cst_10 [1] : vector<8x128xf32> to vector<8xf32>
    %25 = vector.shape_cast %24 : vector<8xf32> to vector<8x1xf32>
    %26 = arith.addf %19, %25 : vector<8x1xf32>
    %c0_11 = arith.constant 0 : index
    %c0_12 = arith.constant 0 : index
    %c0_13 = arith.constant 0 : index
    %27 = vector.load %arg7[%c0_11, %c0_12, %c0_13] : memref<1x8x1xf32, #tpu.memory_space<vmem>>, vector<1x8x1xf32>
    %28 = vector.shape_cast %27 : vector<1x8x1xf32> to vector<8x1xf32>
    %29 = vector.shape_cast %26 : vector<8x1xf32> to vector<1x8x1xf32>
    tpu.vector_store %arg7[%c0_11, %c0_12, %c0_13], %29 {strides = array<i32>} : memref<1x8x1xf32, #tpu.memory_space<vmem>>, vector<1x8x1xf32>,
    %c0_14 = arith.constant 0 : index
    %c0_15 = arith.constant 0 : index
    %c0_16 = arith.constant 0 : index
    %30 = vector.load %arg5[%c0_14, %c0_15, %c0_16] : memref<1x8x1xf32, #tpu.memory_space<vmem>>, vector<1x8x1xf32>
    %31 = vector.shape_cast %30 : vector<1x8x1xf32> to vector<8x1xf32>
    %cst_17 = arith.constant 0xFF800000 : f32
    %32 = vector.broadcast %cst_17 : f32 to vector<8x128xf32>
    %33 = arith.select %17, %6, %32 : vector<8x128xi1>, vector<8x128xf32>
    %cst_18 = arith.constant dense<0xFF800000> : vector<8xf32>
    %34 = vector.multi_reduction <maximumf>, %33, %cst_18 [1] : vector<8x128xf32> to vector<8xf32>
    %35 = vector.shape_cast %34 : vector<8xf32> to vector<8x1xf32>
    %36 = arith.maximumf %31, %35 : vector<8x1xf32>
    %cst_19 = arith.constant 0xFF800000 : f32
    %37 = vector.broadcast %cst_19 : f32 to vector<8x1xf32>
    %38 = arith.cmpf oeq, %36, %37 : vector<8x1xf32>
    %39 = arith.subf %31, %36 : vector<8x1xf32>
    %cst_20 = arith.constant 0.000000e+00 : f32
    %40 = vector.broadcast %cst_20 : f32 to vector<8x1xf32>
    %41 = arith.select %38, %40, %39 : vector<8x1xi1>, vector<8x1xf32>
    %42 = math.exp %41 : vector<8x1xf32>
    %43 = vector.broadcast %36 : vector<8x1xf32> to vector<8x128xf32>
    %44 = arith.subf %6, %43 : vector<8x128xf32>
    %45 = math.exp %44 : vector<8x128xf32>
    %cst_21 = arith.constant 0.000000e+00 : f32
    %46 = vector.broadcast %cst_21 : f32 to vector<8x128xf32>
    %47 = arith.select %17, %45, %46 : vector<8x128xi1>, vector<8x128xf32>
    %c0_22 = arith.constant 0 : index
    %c0_23 = arith.constant 0 : index
    %c0_24 = arith.constant 0 : index
    %48 = vector.load %arg6[%c0_22, %c0_23, %c0_24] : memref<1x8x1xf32, #tpu.memory_space<vmem>>, vector<1x8x1xf32>
    %49 = vector.shape_cast %48 : vector<1x8x1xf32> to vector<8x1xf32>
    %50 = arith.mulf %42, %49 : vector<8x1xf32>
    %cst_25 = arith.constant dense<0.000000e+00> : vector<8xf32>
    %51 = vector.multi_reduction <add>, %47, %cst_25 [1] : vector<8x128xf32> to vector<8xf32>
    %52 = vector.shape_cast %51 : vector<8xf32> to vector<8x1xf32>
    %53 = arith.addf %50, %52 : vector<8x1xf32>
    %c0_26 = arith.constant 0 : index
    %c0_27 = arith.constant 0 : index
    %c0_28 = arith.constant 0 : index
    %54 = vector.load %arg6[%c0_26, %c0_27, %c0_28] : memref<1x8x1xf32, #tpu.memory_space<vmem>>, vector<1x8x1xf32>
    %55 = vector.shape_cast %54 : vector<1x8x1xf32> to vector<8x1xf32>
    %56 = vector.shape_cast %53 : vector<8x1xf32> to vector<1x8x1xf32>
    tpu.vector_store %arg6[%c0_26, %c0_27, %c0_28], %56 {strides = array<i32>} : memref<1x8x1xf32, #tpu.memory_space<vmem>>, vector<1x8x1xf32>,
    %c0_29 = arith.constant 0 : index
    %c0_30 = arith.constant 0 : index
    %c0_31 = arith.constant 0 : index
    %57 = vector.load %arg5[%c0_29, %c0_30, %c0_31] : memref<1x8x1xf32, #tpu.memory_space<vmem>>, vector<1x8x1xf32>
    %58 = vector.shape_cast %57 : vector<1x8x1xf32> to vector<8x1xf32>
    %59 = vector.shape_cast %36 : vector<8x1xf32> to vector<1x8x1xf32>
    tpu.vector_store %arg5[%c0_29, %c0_30, %c0_31], %59 {strides = array<i32>} : memref<1x8x1xf32, #tpu.memory_space<vmem>>, vector<1x8x1xf32>,
    return
  }
  func.func @transform_0(%arg0: i32, %arg1: i32) -> (i32, i32) {
    %c0_i32 = arith.constant 0 : i32
    %c0_i32_0 = arith.constant 0 : i32
    %c0_i32_1 = arith.constant 0 : i32
    return %c0_i32, %c0_i32_0 : i32, i32
  }
  func.func @transform_1(%arg0: i32, %arg1: i32) -> (i32, i32) {
    %c2_i32 = arith.constant 2 : i32
    %0 = arith.muli %arg0, %c2_i32 : i32
    %1 = arith.addi %0, %arg1 : i32
    %c0_i32 = arith.constant 0 : i32
    %c0_i32_0 = arith.constant 0 : i32
    return %c0_i32, %1 : i32, i32
  }
  func.func @transform_2(%arg0: i32, %arg1: i32) -> (i32, i32) {
    %c0_i32 = arith.constant 0 : i32
    %c0_i32_0 = arith.constant 0 : i32
    %c0_i32_1 = arith.constant 0 : i32
    return %c0_i32, %c0_i32_0 : i32, i32
  }
  func.func @transform_3(%arg0: i32, %arg1: i32) -> (i32, i32, i32) {
    %c0_i32 = arith.constant 0 : i32
    %c0_i32_0 = arith.constant 0 : i32
    %c0_i32_1 = arith.constant 0 : i32
    return %arg0, %c0_i32, %c0_i32_0 : i32, i32, i32
  }
  func.func @transform_4(%arg0: i32, %arg1: i32) -> (i32, i32, i32) {
    %c0_i32 = arith.constant 0 : i32
    %c0_i32_0 = arith.constant 0 : i32
    %c0_i32_1 = arith.constant 0 : i32
    return %arg0, %c0_i32, %c0_i32_0 : i32, i32, i32
  }
  func.func @transform_5(%arg0: i32, %arg1: i32) -> (i32, i32, i32) {
    %c0_i32 = arith.constant 0 : i32
    %c0_i32_0 = arith.constant 0 : i32
    %c0_i32_1 = arith.constant 0 : i32
    return %arg0, %c0_i32, %c0_i32_0 : i32, i32, i32
  }
}

</mosaic_0001>

<bundles_post_ra>
// kernel: tpu_custom_call.1
= control target key start
LH: loop header
LB: loop body
LE: loop exit
PB: predicated region body
PF: predicated region fallthrough
CT: control target
= control target key end

     0   :  { %11 = vsyncpa [#allocation3], 0  ;;  %s980_s0 = inlined_call_operand.vmem [shape: f32[8,32], index: 0, kind: input, shape index: {}]   ;;  %s981_s1 = inlined_call_operand.hbm [shape: f32[32,512], index: 1, kind: input, shape index: {}]   ;;  %s982_s2 = inlined_call_operand.vmem [shape: s32[8,1], index: 2, kind: input, shape index: {}]   ;;  %s983_s3 = inlined_call_operand.vmem [shape: f32[2,8,1], index: 3, kind: output, shape index: {0}]   ;;  %s984_s4 = inlined_call_operand.vmem [shape: f32[2,8,1], index: 4, kind: output, shape index: {1}]   ;;  %s985_s5 = inlined_call_operand.vmem [shape: f32[2,8,1], index: 5, kind: output, shape index: {2}]  }
   0x1   :  { %13 = vsyncpa [#allocation3 + $0x1], 0  ;;  %s814_s18 = smov 0   ;;  %s816_s19 = smov 0  }
   0x2   :  { %s818_s20 = smov 0   ;;  %s820_s21 = smov 0  }
   0x3   :  { %s822_s22 = smov 0   ;;  %s824_s23 = smov 0  }
   0x4   :  { %s826_s24 = smov 0   ;;  %s828_s25 = smov 0  }
   0x5 LB: > { %987 = sst [smem:[#allocation5_spill]] %s769_s24  ;;  %s558_s26 = sadd.s32 4294967295, %s773_s25   ;;  %s773_s25 = sphi %s828_s25, %s19_s25   ;;  %s769_s24 = sphi %s826_s24, %s999_s24   ;;  %s765_s23 = sphi %s824_s23, %s998_s23   ;;  %s761_s22 = sphi %s822_s22, %s993_s22   ;;  %s757_s21 = sphi %s820_s21, %s997_s21   ;;  %s753_s20 = sphi %s818_s20, %s996_s20   ;;  %s749_s19 = sphi %s816_s19, %s995_s19   ;;  %s745_s18 = sphi %s814_s18, %s994_s18  }
   0x6   : > { %s28_s27 = sadd.s32 1, %s765_s23  ;;  %s31_s28 = sadd.s32 1, %s769_s24 }
   0x7   : > { %p29_p0 = scmp.ge.s32.totalorder %s28_s27, 2  ;;  %s560_s29 = sshll.u32 %s769_s24, 1 }
   0x8   : > { %s63_s30 = sadd.s32 1, %s753_s20  ;;  %s57_s6 = sadd.s32 %s765_s23, %s560_s29 }
   0x9   : > { %s1001_s27 = smov (%p29_p0, %s28_s27), 0  ;;  %s1003_s28 = smov (!%p29_p0, %s31_s28), %s769_s24 }
   0xa   : > { %p70_p1 = scmp.ne.s32.totalorder %s753_s20, %s749_s19  ;;  %p33_p2 = scmp.ge.s32.totalorder %s1003_s28, 2 }
   0xb   : > { %p71_p3 = scmp.eq.s32.totalorder %s773_s25, 0  ;;  %p76_p4 = scmp.ne.s32.totalorder %s749_s19, %s745_s18 }
   0xc   : > { %p77_p5 = scmp.eq.s32.totalorder %s558_s26, 0  ;;  %s1005_s28 = smov (%p33_p2, %s1003_s28), 0 }
   0xd   : > { %p867_p6 = por %p71_p3, %p70_p1  ;;  %s561_s9 = sshll.u32 %s1005_s28, 1 }
   0xe   : > { %p871_p7 = por %p77_p5, %p76_p4  ;;  %s59_s10 = sadd.s32 %s561_s9, %s1001_s27 }
   0xf   : > { %p600_p8 = scmp.lt.s32.totalorder %s773_s25, 4  ;;  %s60_s11 = ssub.s32 %s57_s6, %s59_s10 }
  0x10   : > { %s205_s12 = sand.u32 1, %s753_s20   ;;  %p61_p9 = scmp.eq.s32.totalorder %s60_s11, 0 }
  0x11   : > { %s564_s13 = sshll.u32 %s205_s12, 5  ;;  %s566_s14 = sshll.u32 %s57_s6, 7 }
  0x12   : > { %s880_s15 = scalar_select %p61_p9, %s753_s20, %s63_s30  }
  0x13   : > { %s216_s18 = scalar_lea.hbm %s981_s1, %s566_s14  ;;  %s209_s26 = scalar_lea.vmem [#allocation2], %s564_s13 }
  0x14   : > { %s217_s29 = sshll.u32 %s209_s26, 4  ;;  %p887_p10 = pnand %p600_p8, %p867_p6  ;;  %s218_s29 = int_to_ptr.vmem [resolvable:$true] %s217_s29 }
  0x15   : > { %p567_p11 = scmp.ge.s32.totalorder %s773_s25, 1  ;;  %s206_s9 = scalar_lea.sflag [#allocation3], %s205_s12 }
  0x16   : > { %p681_p12 = pneg %p887_p10  ;;  %s692_s6 = scalar_lea.vmem %s218_s29, 512 }
  0x17   : > { %p693_p13 = scmp.ne.s32.totalorder %s218_s29, %s692_s6  ;;  %s775_s30 = smov [#allocation2]  }
  0x18   : > { %s697_s10 = sshll.u32 %s775_s30, 4  ;;  %s698_s10 = int_to_ptr.vmem [resolvable:$false] %s697_s10 }
  0x19   : > { %p695_p0 = pnand %p693_p13, %p681_p12  ;;  %s699_s11 = scalar_lea.vmem %s698_s10, 1024 }
  0x1a   : > { %p700_p2 = scmp.lt.s32.totalorder %s218_s29, %s698_s10  ;;  %p701_p3 = scmp.lt.s32.totalorder %s699_s11, %s692_s6 }
  0x1b   : > { %p696_p1 = pneg %p695_p0 }
  0x1c   : > { %p702_p4 = por %p701_p3, %p700_p2 }
  0x1e   : > { %p703_p5 = pnand %p702_p4, %p696_p1 }
  0x20   : > { %706 = shalt.err (!%p703_p5)
}
  0x21   : > { %s776_s7 = smov 512   ;;  %s777_s12 = smov 128  }
  0x22   : > { %s778_s13 = smov 8   ;;  %p225_p6 = scmp.lt.s32.totalorder %s773_s25, 5 }
  0x23   : > { %599 = dma.hbm_to_vmem [thread:$0]  (!%p887_p10), %s216_s18, 512, %s218_s29, %s206_s9, %s776_s7, %s777_s12, %s778_s13  }
  0x24   : > { %p226_p8 = pnand %p567_p11, %p225_p6 }
  0x25   : > { %s231_s14 = sand.u32 (!%p226_p8), 1, %s749_s19  }
  0x26   : > { %229 = sbr.rel (%p226_p8) target bundleno = 682 (0x2aa), region = 32  ;;  %s568_s16 = sshll.u32 (!%p226_p8), %s231_s14, 5 }
  0x27   : > { %s232_s17 = scalar_lea.sflag (!%p226_p8), [#allocation3], %s231_s14  ;;  %s900_s26 = scalar_lea.vmem (!%p226_p8), [#allocation2], %s568_s16 }
  0x2b   : > { %740 = dma.done.wait (%p871_p7), %s232_s17, 512  }
  0x2c   : > { %742 = vsyncadd (%p871_p7), %s232_s17, 4294966784  ;;  %p271_p9 = scmp.lt.s32.totalorder %s761_s22, 1  ;;  %p572_p7 = scmp.ne.s32.totalorder %s757_s21, 0 }
  0x2e   : > { %s272_s24 = scalar_select %p271_p9, %s761_s22, 1 }
  0x2f   : > { %286 = sbr.rel (%p572_p7) target bundleno = 55 (0x37), region = 40 }
  0x30   : > { %s569_s18 = sshll.u32 %s272_s24, 3 }
  0x31   : > { %s911_s6 = scalar_lea.vmem %s983_s3, %s569_s18  ;;  %s916_s11 = scalar_lea.vmem %s984_s4, %s569_s18 }
  0x32   : > { %s921_s8 = scalar_lea.vmem %s985_s5, %s569_s18 }
  0x34   : > { %vm287_vm0 = vcmask 7168   ;;  %v779_v0 = vmov -inf   ;;  %v780_v1 = vmov 0.0  }
  0x35   : > { %288 = vst.msk [vmem:[%s911_s6] sm:$0xff] %vm287_vm0, %v779_v0  ;;  %289 = vst.msk [vmem:[%s916_s11] sm:$0xff] %vm287_vm0, %v780_v1 }
  0x36   : > { %290 = vst.msk [vmem:[%s921_s8] sm:$0xff] %vm287_vm0, %v780_v1 }
  0x37 PF: > { %v295_v2 = vld [vmem:[%s900_s26 + $0x18] sm:$0xff]  ;;  %v781_v3 = vmov 0.0   ;;  %v294_v4 = vld [vmem:[%s900_s26 + $0x10] sm:$0xff]  ;;  %vm782_vm1 = vmmov 0   ;;  %v296_v5 = vld [vmem:[%s982_s2] sm:$0xff]  ;;  %v783_v6 = vmov 0   ;;  %v374_v10 = vlaneseq }
  0x38   : > { %583 = vmatprep.subr.mxu0 %v781_v3  ;;  %591 = vmatprep.mubr.msk.f32.mxu0 %vm782_vm1, %v781_v3  ;;  %v293_v7 = vld [vmem:[%s900_s26 + $0x8] sm:$0xff]  ;;  %v292_v8 = vld [vmem:[%s900_s26] sm:$0xff]  ;;  %vm297_vm2 = vcmask 261120   ;;  %s574_s24 = sshll.u32 %s761_s22, 1  ;;  %vm390_vm7 = vcmask 7168  }
  0x39   : > { %584 = vmatpush3.msra.mxu0 %v295_v2  ;;  %674 = vset.pattern.permute.xlu1 %v783_v6  ;;  %v291_v9 = vld [vmem:[%s980_s0] sm:$0xff]  ;;  %s372_s18 = sadd.s32 %s757_s21, %s574_s24  ;;  %v375_v11 = vand.u32 127, %v374_v10 }
  0x3a   : > { %585 = vmatprep.subr.mxu0 %v781_v3  ;;  %383 = vperm.xlu1 %674, %v296_v5   ;;  %s575_s29 = sshll.u32 %s372_s18, 7 }
  0x3b   : > { %586 = vmatpush3.msra.mxu0 %v294_v4  ;;  %673 = vset.pattern.permute.xlu0 %v783_v6  ;;  %v376_v12 = vstv %s575_s29 }
  0x3c   : > { %587 = vmatprep.subr.mxu0 %v781_v3  ;;  %v377_v13 = vadd.s32 %v376_v12, %v375_v11  ;;  %v392_v20 = vld [vmem:[%s911_s6] sm:$0xff] }
  0x3d   : > { %588 = vmatpush3.msra.mxu0 %v293_v7  ;;  %v381_v21 = vld [vmem:[%s921_s8] sm:$0xff] }
  0x3e   : > { %589 = vmatprep.subr.mxu0 %v781_v3  ;;  %vm378_vm3 = vcmp.ge.s32.totalorder %v377_v13, 1  ;;  %vm379_vm4 = vcmp.lt.s32.totalorder %v377_v13, 301  ;;  %v411_v35 = vld [vmem:[%s916_s11] sm:$0xff] }
  0x3f   : > { %590 = vmatpush3.msra.mxu0 %v292_v8  ;;  %vm939_vm6 = vmand %vm378_vm3, %vm379_vm4 }
  0x40   : > { %592 = vmatmul.mubr.msk.f32.vlgmr.msra.gmra.mxu0 %vm297_vm2, %v291_v9 }
  0xb5   : > { %v384_v14 = vpop.permute.xlu1 %383 }
  0xb6   : > { %vm385_vm5 = vcmp.eq.s32.totalorder %v377_v13, %v384_v14 }
 0x100   : > { %v367_v16 = vpop.f32.mrf.mxu0 }
 0x101   : > { %v393_v17 = vsel %vm939_vm6, %v367_v16, -inf  ;;  %v386_v18 = vsel %vm385_vm5, %v367_v16, 0.0 }
 0x102   : > { %394 = vmax.xlane.f32.xlu0 %v393_v17  ;;  %387 = vadd.xlane.f32.xlu1 %v386_v18  ;;  %v593_v19 = vpop.f32.mrf.mxu0 }
 0x18b   : > { %v395_v22 = vpop.xlane.xlu0 %394  ;;  %v388_v23 = vpop.xlane.xlu1 %387 }
 0x18c   : > { %v396_v24 = vmax.f32 %v392_v20, %v395_v22  ;;  %v389_v25 = vadd.f32 %v388_v23, %v381_v21 }
 0x18e   : > { %vm397_vm8 = vcmp.eq.f32.partialorder %v396_v24, -inf  ;;  %v398_v26 = vsub.f32 %v392_v20, %v396_v24  ;;  %417 = vst.msk [vmem:[%s911_s6] sm:$0xff] %vm390_vm7, %v396_v24  ;;  %391 = vst.msk [vmem:[%s921_s8] sm:$0xff] %vm390_vm7, %v389_v25  ;;  %404 = vperm.xlu0 %673, %v396_v24  }
 0x190   : > { %v399_v27 = vsel %vm397_vm8, 0.0, %v398_v26 }
 0x191   : > { %v400_v33 = vmul.f32 1.442695, %v399_v27 }
 0x209   : > { %v405_v28 = vpop.permute.xlu0 %404 }
 0x20a   : > { %v407_v29 = vsub.f32 %v367_v16, %v405_v28 }
 0x20c   : > { %v408_v30 = vmul.f32 1.442695, %v407_v29 }
 0x20e   : > { %675 = vpow2.f32 %v408_v30 }
 0x20f   : > { %677 = vpow2.f32 %v400_v33 }
 0x21b   : > { %v676_v31 = vpop.eup %675 }
 0x21c   : > { %v410_v32 = vsel %vm939_vm6, %v676_v31, 0.0  ;;  %v678_v34 = vpop.eup %677 }
 0x21d   : > { %413 = vadd.xlane.f32.xlu1 %v410_v32  ;;  %v412_v36 = vmul.f32 %v678_v34, %v411_v35 }
 0x2a6   : > { %v414_v37 = vpop.xlane.xlu1 %413 }
 0x2a7   : > { %v415_v38 = vadd.f32 %v414_v37, %v412_v36 }
 0x2a9   : > { %416 = vst.msk [vmem:[%s916_s11] sm:$0xff] %vm390_vm7, %v415_v38 }
 0x2aa PF: > { %s19_s25 = sadd.s32 1, %s773_s25   ;;  %s993_s22 = sld [smem:[#allocation5_spill]] }
 0x2ab   : > { %p16_p10 = scmp.ge.s32.totalorder %s19_s25, 6   ;;  %s994_s18 = smov %s749_s19 }
 0x2ac   : > { %s995_s19 = smov %s753_s20  ;;  %s996_s20 = smov %s880_s15 }
 0x2ad   : > { %s997_s21 = smov %s765_s23  ;;  %s998_s23 = smov %s1001_s27 }
 0x2ae   : > { %s999_s24 = smov %s1005_s28  ;;  %18 = sbr.rel (!%p16_p10) target bundleno = 5 (0x5), region = 100 }
 0x2b3   :  { %465 = vsyncpa [#allocation3], 1 }
 0x2b4   :  { %467 = vsyncpa [#allocation3 + $0x1], 1 }

</bundles_post_ra>
